<compile_context>
chip_gen: v7x
topology: tpu7x:2x2x1
jax: 0.10.0
libtpu: 0.0.40
codegen_flags: <defaults>
</compile_context>

<pallas_src>
import functools

import jax
import jax.numpy as jnp
from jax.experimental import pallas as pl
from jax.experimental.pallas import tpu as pltpu


def _round_up(x, m):
    return (x + m - 1) // m * m


# ---------------------------------------------------------------------------
# Kernel
# ---------------------------------------------------------------------------
def dqn_dueling_kernel(x_ref, wenc_ref, benc_ref, whead_ref, bhead_ref, q_ref,
                       *, num_actions):
    # Encoder stand-in: Linear + ReLU (f32 accumulation on the MXU).
    h = jnp.dot(x_ref[...], wenc_ref[...], preferred_element_type=jnp.float32)
    h = jnp.maximum(h + benc_ref[...], 0.0)                       # (Bt, H) f32
    h = h.astype(whead_ref.dtype)                                 # bf16 fast path

    # Fused dueling head: single lane-dense (H, N_pad) MXU pass.
    #   cols [0, A)  -> advantage
    #   col  A       -> value
    #   col  A + 1   -> sum over advantage columns (mean folded into the MXU)
    #   cols > A + 1 -> zero padding
    out = jnp.dot(h, whead_ref[...], preferred_element_type=jnp.float32)
    out = out + bhead_ref[...]                                    # (Bt, N_pad) f32

    v = out[:, num_actions:num_actions + 1]                       # (Bt, 1)
    a_mean = out[:, num_actions + 1:num_actions + 2] * (1.0 / num_actions)

    # q = v + (a - mean(a)).  Padded columns hold don't-care values and are
    # sliced away in the wrapper, so no masking is needed (unmasked vst).
    q_ref[...] = (v + out - a_mean).astype(q_ref.dtype)


# ---------------------------------------------------------------------------
# One-time parameter prep (hoisted out of the per-call forward)
# ---------------------------------------------------------------------------
def prepare_dqn_params(w_enc, b_enc, w_v, b_v, w_a, b_a,
                       compute_dtype=jnp.float32):
    """Fuse/pad the weights once; reuse the result for every forward call."""
    H = w_enc.shape[1]
    A = w_a.shape[1]
    n_pad = _round_up(A + 2, 128)               # lane-dense head output width

    w_head = jnp.zeros((H, n_pad), jnp.float32)
    w_head = w_head.at[:, :A].set(w_a.astype(jnp.float32))
    w_head = w_head.at[:, A].set(w_v[:, 0].astype(jnp.float32))
    w_head = w_head.at[:, A + 1].set(jnp.sum(w_a, axis=1).astype(jnp.float32))

    b_head = jnp.zeros((1, n_pad), jnp.float32)
    b_head = b_head.at[:, :A].set(b_a.astype(jnp.float32))
    b_head = b_head.at[:, A].set(b_v[:, 0].astype(jnp.float32))
    b_head = b_head.at[:, A + 1].set(jnp.sum(b_a).astype(jnp.float32))

    return {
        "w_enc": w_enc.astype(compute_dtype),
        "b_enc": b_enc.astype(jnp.float32).reshape(1, H),   # biases stay f32
        "w_head": w_head.astype(compute_dtype),
        "b_head": b_head,
        "num_actions": A,
        "compute_dtype": compute_dtype,
    }


# ---------------------------------------------------------------------------
# Forward wrapper
# ---------------------------------------------------------------------------
def dqn_forward(x, params, *, block_b=512):
    w_enc = params["w_enc"]
    b_enc = params["b_enc"]
    w_head = params["w_head"]
    b_head = params["b_head"]
    A = params["num_actions"]
    cdt = params["compute_dtype"]

    B, d_in = x.shape
    H = w_enc.shape[1]
    n_pad = w_head.shape[1]

    # Batch tile: force a multiple of 8, and cap at ~B/2 so the 1-D "parallel"
    # grid has >= 2 steps for large batches (v7x 2-TensorCore sharding).
    block_b = _round_up(max(block_b, 8), 8)
    bb = min(block_b, max(8, _round_up(pl.cdiv(B, 2), 8)))
    b_pad = _round_up(B, bb)

    # Per-call input prep: cast for the bf16 fast path and pad ONLY the batch
    # dim when needed.  d_in is left unpadded; x / w_enc blocks use the full
    # array extent on that axis (which satisfies the (8,128) rule).
    x_c = x if x.dtype == cdt else x.astype(cdt)
    if b_pad != B:
        x_c = jnp.pad(x_c, ((0, b_pad - B), (0, 0)))

    grid = (b_pad // bb,)
    itemsize = jnp.dtype(cdt).itemsize
    flops = 2 * b_pad * (d_in * H + H * n_pad)
    bytes_accessed = (itemsize * (x_c.size + w_enc.size + w_head.size)
                      + 4 * (b_enc.size + b_head.size + b_pad * n_pad))

    q_pad = pl.pallas_call(
        functools.partial(dqn_dueling_kernel, num_actions=A),
        out_shape=jax.ShapeDtypeStruct((b_pad, n_pad), jnp.float32),
        grid_spec=pltpu.PrefetchScalarGridSpec(
            num_scalar_prefetch=0,
            grid=grid,
            in_specs=[
                pl.BlockSpec((bb, d_in), lambda i: (i, 0)),    # x batch tile
                pl.BlockSpec((d_in, H), lambda i: (0, 0)),     # enc W (VMEM-resident)
                pl.BlockSpec((1, H), lambda i: (0, 0)),        # enc b (resident)
                pl.BlockSpec((H, n_pad), lambda i: (0, 0)),    # fused head W
                pl.BlockSpec((1, n_pad), lambda i: (0, 0)),    # fused head b
            ],
            out_specs=pl.BlockSpec((bb, n_pad), lambda i: (i, 0)),
        ),
        compiler_params=pltpu.CompilerParams(
            dimension_semantics=("parallel",)),
        cost_estimate=pl.CostEstimate(
            flops=flops, transcendentals=0, bytes_accessed=bytes_accessed),
    )(x_c, w_enc, b_enc, w_head, b_head)

    return q_pad[:B, :A]


# ---------------------------------------------------------------------------
# Reference / init helpers
# ---------------------------------------------------------------------------
def kaiming_normal_fan_in(key, fan_in, fan_out, dtype=jnp.float32):
    # nn.init.kaiming_normal_(w, mode='fan_in', nonlinearity='relu'):
    # std = sqrt(2 / fan_in), generated in (fan_in, fan_out) layout for x @ W.
    std = jnp.sqrt(2.0 / fan_in).astype(dtype)
    return std * jax.random.normal(key, (fan_in, fan_out), dtype=dtype)


def reference_forward(x, w_enc, b_enc, w_v, b_v, w_a, b_a):
    h = jnp.maximum(x @ w_enc + b_enc, 0.0)
    v = h @ w_v + b_v
    a = h @ w_a + b_a
    a = a - jnp.mean(a, axis=1, keepdims=True)
    return v + a


if __name__ == "__main__":
    B, D_IN, HIDDEN, NUM_ACTIONS = 8, 64, 128, 6

    key = jax.random.PRNGKey(0)
    k_x, k_enc, k_v, k_a = jax.random.split(key, 4)

    # Inputs (stand-in for encoder input features).
    x = jax.random.normal(k_x, (B, D_IN), dtype=jnp.float32)

    # Encoder stand-in: Linear(D_IN, HIDDEN) + ReLU.
    w_enc = kaiming_normal_fan_in(k_enc, D_IN, HIDDEN)
    b_enc = jnp.zeros((1, HIDDEN), dtype=jnp.float32)

    # Dueling heads: fc_v: Linear(HIDDEN, 1), fc_a: Linear(HIDDEN, NUM_ACTIONS).
    w_v = kaiming_normal_fan_in(k_v, HIDDEN, 1)
    b_v = jnp.zeros((1, 1), dtype=jnp.float32)
    w_a = kaiming_normal_fan_in(k_a, HIDDEN, NUM_ACTIONS)
    b_a = jnp.zeros((1, NUM_ACTIONS), dtype=jnp.float32)

    q_ref = reference_forward(x, w_enc, b_enc, w_v, b_v, w_a, b_a)

    # f32 path: faithful to the PyTorch f32 forward.
    params_f32 = prepare_dqn_params(w_enc, b_enc, w_v, b_v, w_a, b_a,
                                    compute_dtype=jnp.float32)
    q = jax.block_until_ready(dqn_forward(x, params_f32))
    assert q.shape == (B, NUM_ACTIONS)
    assert jnp.allclose(q, q_ref, atol=1e-5, rtol=1e-5)

    # bf16 fast path (v6e/v7x MXU-native); f32 accumulation, relaxed tolerance.
    params_bf16 = prepare_dqn_params(w_enc, b_enc, w_v, b_v, w_a, b_a,
                                     compute_dtype=jnp.bfloat16)
    q16 = jax.block_until_ready(dqn_forward(x, params_bf16))
    assert q16.shape == (B, NUM_ACTIONS)
    assert jnp.allclose(q16, q_ref, atol=1e-1, rtol=1e-1)

    print("KERNEL_OK")
</pallas_src>

<mosaic_0001>
module attributes {stable_mosaic.version = 11 : i64} {
  func.func @dqn_dueling_kernel(%arg0: i32, %arg1: memref<8x64xf32, #tpu.memory_space<vmem>>, %arg2: memref<64x128xf32, #tpu.memory_space<vmem>>, %arg3: memref<1x128xf32, #tpu.memory_space<vmem>>, %arg4: memref<128x128xf32, #tpu.memory_space<vmem>>, %arg5: memref<1x128xf32, #tpu.memory_space<vmem>>, %arg6: memref<8x128xf32, #tpu.memory_space<vmem>>) attributes {dimension_semantics = [#tpu.dimension_semantics<parallel>], iteration_bounds = array<i64: 1>, scalar_prefetch = 0 : i64, scratch_operands = 0 : i64, tpu.core_type = #tpu.core_type<tc>, window_params = [{transform_indices = @transform_0, window_bounds = array<i64: 8, 64>}, {pipeline_mode = #tpu.pipeline_mode<synchronous>, transform_indices = @transform_1, window_bounds = array<i64: 64, 128>}, {pipeline_mode = #tpu.pipeline_mode<synchronous>, transform_indices = @transform_2, window_bounds = array<i64: 1, 128>}, {pipeline_mode = #tpu.pipeline_mode<synchronous>, transform_indices = @transform_3, window_bounds = array<i64: 128, 128>}, {pipeline_mode = #tpu.pipeline_mode<synchronous>, transform_indices = @transform_4, window_bounds = array<i64: 1, 128>}, {transform_indices = @transform_5, window_bounds = array<i64: 8, 128>}]} {
    %c0 = arith.constant 0 : index
    %c0_0 = arith.constant 0 : index
    %0 = vector.load %arg1[%c0, %c0_0] : memref<8x64xf32, #tpu.memory_space<vmem>>, vector<8x64xf32>
    %c0_1 = arith.constant 0 : index
    %c0_2 = arith.constant 0 : index
    %1 = vector.load %arg2[%c0_1, %c0_2] : memref<64x128xf32, #tpu.memory_space<vmem>>, vector<64x128xf32>
    %cst = arith.constant dense<0.000000e+00> : vector<8x128xf32>
    %2 = tpu.matmul %0, %1, %cst {dimension_numbers = #tpu.dot_dimension_numbers<[1], [0], [0], [1], [0, 0, 1, 1], [], []>} : vector<8x64xf32>, vector<64x128xf32>, vector<8x128xf32> -> vector<8x128xf32>
    %c0_3 = arith.constant 0 : index
    %c0_4 = arith.constant 0 : index
    %3 = vector.load %arg3[%c0_3, %c0_4] : memref<1x128xf32, #tpu.memory_space<vmem>>, vector<1x128xf32>
    %4 = vector.broadcast %3 : vector<1x128xf32> to vector<8x128xf32>
    %5 = arith.addf %2, %4 : vector<8x128xf32>
    %cst_5 = arith.constant 0.000000e+00 : f32
    %6 = vector.broadcast %cst_5 : f32 to vector<8x128xf32>
    %7 = arith.maximumf %5, %6 : vector<8x128xf32>
    %c0_6 = arith.constant 0 : index
    %c0_7 = arith.constant 0 : index
    %8 = vector.load %arg4[%c0_6, %c0_7] : memref<128x128xf32, #tpu.memory_space<vmem>>, vector<128x128xf32>
    %cst_8 = arith.constant dense<0.000000e+00> : vector<8x128xf32>
    %9 = tpu.matmul %7, %8, %cst_8 {dimension_numbers = #tpu.dot_dimension_numbers<[1], [0], [0], [1], [0, 0, 1, 1], [], []>} : vector<8x128xf32>, vector<128x128xf32>, vector<8x128xf32> -> vector<8x128xf32>
    %c0_9 = arith.constant 0 : index
    %c0_10 = arith.constant 0 : index
    %10 = vector.load %arg5[%c0_9, %c0_10] : memref<1x128xf32, #tpu.memory_space<vmem>>, vector<1x128xf32>
    %11 = vector.broadcast %10 : vector<1x128xf32> to vector<8x128xf32>
    %12 = arith.addf %9, %11 : vector<8x128xf32>
    %13 = vector.extract_strided_slice %12 {offsets = [0, 6], sizes = [8, 1], strides = [1, 1]} : vector<8x128xf32> to vector<8x1xf32>
    %14 = vector.extract_strided_slice %12 {offsets = [0, 7], sizes = [8, 1], strides = [1, 1]} : vector<8x128xf32> to vector<8x1xf32>
    %cst_11 = arith.constant 0.166666672 : f32
    %15 = vector.broadcast %cst_11 : f32 to vector<8x1xf32>
    %16 = arith.mulf %14, %15 : vector<8x1xf32>
    %17 = vector.broadcast %13 : vector<8x1xf32> to vector<8x128xf32>
    %18 = arith.addf %17, %12 : vector<8x128xf32>
    %19 = vector.broadcast %16 : vector<8x1xf32> to vector<8x128xf32>
    %20 = arith.subf %18, %19 : vector<8x128xf32>
    %c0_12 = arith.constant 0 : index
    %c0_13 = arith.constant 0 : index
    %21 = vector.load %arg6[%c0_12, %c0_13] : memref<8x128xf32, #tpu.memory_space<vmem>>, vector<8x128xf32>
    tpu.vector_store %arg6[%c0_12, %c0_13], %20 {strides = array<i32>} : memref<8x128xf32, #tpu.memory_space<vmem>>, vector<8x128xf32>,
    return
  }
  func.func @transform_0(%arg0: i32) -> (i32, i32) {
    %c0_i32 = arith.constant 0 : i32
    %c0_i32_0 = arith.constant 0 : i32
    return %arg0, %c0_i32 : i32, i32
  }
  func.func @transform_1(%arg0: i32) -> (i32, i32) {
    %c0_i32 = arith.constant 0 : i32
    %c0_i32_0 = arith.constant 0 : i32
    %c0_i32_1 = arith.constant 0 : i32
    return %c0_i32, %c0_i32_0 : i32, i32
  }
  func.func @transform_2(%arg0: i32) -> (i32, i32) {
    %c0_i32 = arith.constant 0 : i32
    %c0_i32_0 = arith.constant 0 : i32
    %c0_i32_1 = arith.constant 0 : i32
    return %c0_i32, %c0_i32_0 : i32, i32
  }
  func.func @transform_3(%arg0: i32) -> (i32, i32) {
    %c0_i32 = arith.constant 0 : i32
    %c0_i32_0 = arith.constant 0 : i32
    %c0_i32_1 = arith.constant 0 : i32
    return %c0_i32, %c0_i32_0 : i32, i32
  }
  func.func @transform_4(%arg0: i32) -> (i32, i32) {
    %c0_i32 = arith.constant 0 : i32
    %c0_i32_0 = arith.constant 0 : i32
    %c0_i32_1 = arith.constant 0 : i32
    return %c0_i32, %c0_i32_0 : i32, i32
  }
  func.func @transform_5(%arg0: i32) -> (i32, i32) {
    %c0_i32 = arith.constant 0 : i32
    %c0_i32_0 = arith.constant 0 : i32
    return %arg0, %c0_i32 : i32, i32
  }
}

</mosaic_0001>

<bundles_post_ra>
// kernel: tpu_custom_call.1
= control target key start
LH: loop header
LB: loop body
LE: loop exit
PB: predicated region body
PF: predicated region fallthrough
CT: control target
= control target key end

     0   :  { %10 = vsyncpa [#allocation3], 0  ;;  %s601_s0 = inlined_call_operand.hbm [shape: f32[8,64], index: 0, kind: input, shape index: {}]   ;;  %s602_s1 = inlined_call_operand.hbm [shape: f32[64,128], index: 1, kind: input, shape index: {}]   ;;  %s603_s2 = inlined_call_operand.vmem [shape: f32[1,128], index: 2, kind: input, shape index: {}]   ;;  %s604_s3 = inlined_call_operand.hbm [shape: f32[128,128], index: 3, kind: input, shape index: {}]   ;;  %s605_s4 = inlined_call_operand.vmem [shape: f32[1,128], index: 4, kind: input, shape index: {}]   ;;  %s606_s5 = inlined_call_operand.hbm [shape: f32[8,128], index: 5, kind: output, shape index: {}]  }
   0x1   :  { %11 = vsyncpa [#allocation6], 0 }
   0x2   :  { %12 = vsyncpa [#allocation4], 0  ;;  %s500_s18 = smov [#allocation5]   ;;  %s406_s22 = scalar_lea.hbm %s602_s1, 1024 }
   0x3   :  { %s28_s19 = sshll.u32 %s500_s18, 4  ;;  %p407_p0 = scmp.ne.s32.totalorder %s602_s1, %s406_s22  ;;  %s29_s19 = int_to_ptr.vmem [resolvable:$true] %s28_s19 }
   0x4   :  { %p410_p1 = scmp.lt.u32.totalorder %s406_s22, %s602_s1 }
   0x6   :  { %p412_p2 = pnand %p410_p1, %p407_p0 }
   0x8   :  { %415 = shalt.err (!%p412_p2)
}
   0x9   :  { %s416_s27 = scalar_lea.vmem %s29_s19, 1024  ;;  %p421_p4 = scmp.lt.s32.totalorder %s29_s19, %s29_s19 }
   0xa   :  { %p417_p3 = scmp.ne.s32.totalorder %s29_s19, %s416_s27  ;;  %p422_p5 = scmp.lt.s32.totalorder %s416_s27, %s416_s27 }
   0xc   :  { %p423_p6 = por %p422_p5, %p421_p4 }
   0xe   :  { %p424_p7 = pnand %p423_p6, %p417_p3 }
  0x10   :  { %427 = shalt.err (!%p424_p7)
}
  0x11   :  { %s501_s28 = smov 128   ;;  %s502_s29 = smov 8  }
  0x12   :  { %34 = dma.hbm_to_vmem [thread:$0]  %s602_s1, 1024, %s29_s19, [#allocation6], %s501_s28, %s501_s28, %s502_s29  }
  0x13   :  { %s503_s7 = smov [#allocation2]   ;;  %s504_s9 = smov [#allocation7]  }
  0x14   :  { %s19_s8 = sshll.u32 %s503_s7, 4  ;;  %s42_s10 = sshll.u32 %s504_s9, 4  ;;  %s20_s8 = int_to_ptr.vmem [resolvable:$true] %s19_s8  ;;  %s43_s10 = int_to_ptr.vmem [resolvable:$true] %s42_s10 }
  0x15   :  { %s428_s13 = scalar_lea.hbm %s601_s0, 128 }
  0x16   :  { %p429_p8 = scmp.ne.s32.totalorder %s601_s0, %s428_s13  ;;  %p432_p9 = scmp.lt.u32.totalorder %s428_s13, %s601_s0 }
  0x18   :  { %p434_p10 = pnand %p432_p9, %p429_p8 }
  0x1a   :  { %437 = shalt.err (!%p434_p10)
}
  0x1b   :  { %s438_s1 = scalar_lea.vmem %s20_s8, 128  ;;  %p443_p12 = scmp.lt.s32.totalorder %s20_s8, %s20_s8 }
  0x1c   :  { %p439_p11 = scmp.ne.s32.totalorder %s20_s8, %s438_s1  ;;  %p444_p13 = scmp.lt.s32.totalorder %s438_s1, %s438_s1 }
  0x1e   :  { %p445_p0 = por %p444_p13, %p443_p12 }
  0x20   :  { %p446_p1 = pnand %p445_p0, %p439_p11 }
  0x22   :  { %449 = shalt.err (!%p446_p1)
}
  0x23   :  { %22 = dma.hbm_to_vmem [thread:$0]  %s601_s0, 128, %s20_s8, [#allocation3]  }
  0x24   :  { %s450_s22 = scalar_lea.hbm %s604_s3, 2048 }
  0x25   :  { %p451_p2 = scmp.ne.s32.totalorder %s604_s3, %s450_s22  ;;  %p454_p3 = scmp.lt.u32.totalorder %s450_s22, %s604_s3 }
  0x27   :  { %p456_p4 = pnand %p454_p3, %p451_p2 }
  0x29   :  { %459 = shalt.err (!%p456_p4)
}
  0x2a   :  { %s460_s27 = scalar_lea.vmem %s43_s10, 2048  ;;  %p465_p6 = scmp.lt.s32.totalorder %s43_s10, %s43_s10 }
  0x2b   :  { %p461_p5 = scmp.ne.s32.totalorder %s43_s10, %s460_s27  ;;  %p466_p7 = scmp.lt.s32.totalorder %s460_s27, %s460_s27 }
  0x2d   :  { %p467_p8 = por %p466_p7, %p465_p6 }
  0x2f   :  { %p468_p9 = pnand %p467_p8, %p461_p5 }
  0x31   :  { %471 = shalt.err (!%p468_p9)
}
  0x32   :  { %48 = dma.hbm_to_vmem [thread:$0]  %s604_s3, 2048, %s43_s10, [#allocation6], %s501_s28, %s501_s28, %s502_s29  }
  0x33   :  { %494 = dma.done.wait [#allocation3], 128  }
  0x34   :  { %495 = vsyncadd [#allocation3], 4294967168 }
  0x35   :  { %496 = dma.done.wait [#allocation6], 3072  }
  0x36   :  { %497 = vsyncadd [#allocation6], 4294964224  ;;  %v505_v0 = vmov 0.0|0.0   ;;  %vm506_vm0 = vmmov 0   ;;  %v507_v1 = vmov 0.0   ;;  %v61_v2 = vld [vmem:[#allocation5] sm:$0xff] }
  0x37   :  { %357 = vmatprep.subr.bf16.mxu0 %v505_v0  ;;  %319 = vmatprep.mubr.msk.f32.mxu0 %vm506_vm0, %v507_v1  ;;  %v62_v3 = vld [vmem:[#allocation5 + $0x8] sm:$0xff]  ;;  %v63_v4 = vld [vmem:[#allocation5 + $0x10] sm:$0xff]  ;;  %v64_v6 = vld [vmem:[#allocation5 + $0x18] sm:$0xff]  ;;  %vm76_vm1 = vcmask 523264   ;;  %v508_v44 = vmov 6   ;;  %v509_v50 = vmov 7  }
  0x38   :  { %369 = vmatprep.subr.bf16.mxu1 %v505_v0  ;;  %354 = vmatprep.mubr.msk.f32.mxu1 %vm506_vm0, %v507_v1  ;;  %v358_v5 = vpack.c.bf16 %v62_v3, %v61_v2  ;;  %v361_v7 = vpack.c.bf16 %v64_v6, %v63_v4  ;;  %v151_v8 = vld [vmem:[#allocation7] sm:$0xff]  ;;  %v152_v9 = vld [vmem:[#allocation7 + $0x8] sm:$0xff]  ;;  %v153_v10 = vld [vmem:[#allocation7 + $0x10] sm:$0xff] }
  0x39   :  { %v65_v11 = vld [vmem:[#allocation5 + $0x20] sm:$0xff]  ;;  %v66_v12 = vld [vmem:[#allocation5 + $0x28] sm:$0xff]  ;;  %v370_v13 = vpack.c.bf16 %v152_v9, %v151_v8  ;;  %v154_v14 = vld [vmem:[#allocation7 + $0x18] sm:$0xff]  ;;  %404 = vset.pattern.permute.xlu0 %v508_v44 }
  0x3a   :  { %359 = vmatpush3.bf16.msra.mxu0 %v358_v5  ;;  %v373_v15 = vpack.c.bf16 %v154_v14, %v153_v10  ;;  %v364_v16 = vpack.c.bf16 %v66_v12, %v65_v11  ;;  %v155_v17 = vld [vmem:[#allocation7 + $0x20] sm:$0xff]  ;;  %v156_v18 = vld [vmem:[#allocation7 + $0x28] sm:$0xff]  ;;  %v67_v19 = vld [vmem:[#allocation5 + $0x30] sm:$0xff] }
  0x3b   :  { %360 = vmatprep.subr.bf16.mxu0 %v505_v0  ;;  %371 = vmatpush3.bf16.msra.mxu1 %v370_v13  ;;  %v68_v20 = vld [vmem:[#allocation5 + $0x38] sm:$0xff]  ;;  %v376_v21 = vpack.c.bf16 %v156_v18, %v155_v17  ;;  %v157_v23 = vld [vmem:[#allocation7 + $0x30] sm:$0xff]  ;;  %v159_v27 = vld [vmem:[#allocation7 + $0x40] sm:$0xff] }
  0x3c   :  { %372 = vmatprep.subr.bf16.mxu1 %v505_v0  ;;  %v367_v22 = vpack.c.bf16 %v68_v20, %v67_v19  ;;  %v158_v24 = vld [vmem:[#allocation7 + $0x38] sm:$0xff]  ;;  %v160_v28 = vld [vmem:[#allocation7 + $0x48] sm:$0xff]  ;;  %v161_v30 = vld [vmem:[#allocation7 + $0x50] sm:$0xff] }
  0x3d   :  { %v379_v25 = vpack.c.bf16 %v158_v24, %v157_v23  ;;  %v60_v26 = vld [vmem:[#allocation2] sm:$0xff]  ;;  %v382_v29 = vpack.c.bf16 %v160_v28, %v159_v27  ;;  %v163_v33 = vld [vmem:[#allocation7 + $0x60] sm:$0xff]  ;;  %v164_v34 = vld [vmem:[#allocation7 + $0x68] sm:$0xff] }
  0x3e   :  { %362 = vmatpush3.bf16.msra.mxu0 %v361_v7  ;;  %v162_v31 = vld [vmem:[#allocation7 + $0x58] sm:$0xff]  ;;  %v388_v35 = vpack.c.bf16 %v164_v34, %v163_v33  ;;  %v165_v36 = vld [vmem:[#allocation7 + $0x70] sm:$0xff] }
  0x3f   :  { %363 = vmatprep.subr.bf16.mxu0 %v505_v0  ;;  %374 = vmatpush3.bf16.msra.mxu1 %v373_v15  ;;  %v385_v32 = vpack.c.bf16 %v162_v31, %v161_v30  ;;  %v166_v37 = vld [vmem:[#allocation7 + $0x78] sm:$0xff] }
  0x40   :  { %375 = vmatprep.subr.bf16.mxu1 %v505_v0  ;;  %v391_v38 = vpack.c.bf16 %v166_v37, %v165_v36  ;;  %v274_v39 = vld [vmem:[%s603_s2] ss:$0 sm:$0xff]  ;;  %s510_s2 = smov [#allocation8]  }
  0x41   :  { %v276_v45 = vld [vmem:[%s605_s4] ss:$0 sm:$0xff]  ;;  %s264_s7 = sshll.u32 %s510_s2, 4  ;;  %s265_s7 = int_to_ptr.vmem [resolvable:$true] %s264_s7 }
  0x42   :  { %365 = vmatpush3.bf16.msra.mxu0 %v364_v16  ;;  %s472_s8 = scalar_lea.vmem %s265_s7, 128  ;;  %p477_p11 = scmp.lt.s32.totalorder %s265_s7, %s265_s7 }
  0x43   :  { %366 = vmatprep.subr.bf16.mxu0 %v505_v0  ;;  %377 = vmatpush3.bf16.msra.mxu1 %v376_v21  ;;  %p473_p10 = scmp.ne.s32.totalorder %s265_s7, %s472_s8  ;;  %p478_p12 = scmp.lt.s32.totalorder %s472_s8, %s472_s8 }
  0x44   :  { %378 = vmatprep.subr.bf16.mxu1 %v505_v0 }
  0x45   :  { %p479_p13 = por %p478_p12, %p477_p11 }
  0x46   :  { %368 = vmatpush3.bf16.msra.mxu0 %v367_v22 }
  0x47   :  { %380 = vmatpush3.bf16.msra.mxu1 %v379_v25  ;;  %p480_p0 = pnand %p479_p13, %p473_p10 }
  0x48   :  { %381 = vmatprep.subr.bf16.mxu1 %v505_v0 }
  0x49   :  { %320 = vmatmul.mubr.msk.f32.vlgmr.msra.gmra.mrb[0].mxu0 %vm76_vm1, %v60_v26 }
  0x4b   :  { %383 = vmatpush3.bf16.msra.mxu1 %v382_v29 }
  0x4c   :  { %384 = vmatprep.subr.bf16.mxu1 %v505_v0 }
  0x4f   :  { %386 = vmatpush3.bf16.msra.mxu1 %v385_v32 }
  0x50   :  { %387 = vmatprep.subr.bf16.mxu1 %v505_v0 }
  0x53   :  { %389 = vmatpush3.bf16.msra.mxu1 %v388_v35 }
  0x54   :  { %390 = vmatprep.subr.bf16.mxu1 %v505_v0 }
  0x57   :  { %392 = vmatpush3.bf16.msra.mxu1 %v391_v38 }
 0x11c   :  { %v146_v40 = vpop.f32.mrb[0].mxu0 }
 0x11d   :  { %v147_v41 = vadd.f32 %v274_v39, %v146_v40  ;;  %v321_v42 = vpop.f32.mrb[1].mxu0 }
 0x11f   :  { %v150_v43 = vmax.f32 %v147_v41, 0.0 }
 0x121   :  { %355 = vmatmul.mubr.f32.vlgmr.msra.gmra.mrb[0].mxu1 %v150_v43 }
 0x1f4   :  { %v240_v46 = vpop.f32.mrb[0].mxu1 }
 0x1f5   :  { %v241_v47 = vadd.f32 %v276_v45, %v240_v46  ;;  %v356_v48 = vpop.f32.mrb[1].mxu1 }
 0x1f7   :  { %247 = vperm.xlu0 %404, %v241_v47   ;;  %v244_v49 = vmul.f32 0.16666667, %v241_v47 }
 0x1fb   :  { %405 = vset.pattern.permute.xlu0 %v509_v50 }
 0x1fc   :  { %253 = vperm.xlu0 %405, %v244_v49  }
 0x276   :  { %v248_v51 = vpop.permute.xlu0 %247 }
 0x277   :  { %v250_v52 = vadd.f32 %v248_v51, %v241_v47 }
 0x27b   :  { %v254_v53 = vpop.permute.xlu0 %253 }
 0x27c   :  { %v256_v54 = vsub.f32 %v250_v52, %v254_v53 }
 0x27e   :  { %257 = vst [vmem:[#allocation8] sm:$0xff] %v256_v54 }
 0x27f   :  { %483 = shalt.err (!%p480_p0)
}
 0x280   :  { %s484_s10 = scalar_lea.hbm %s606_s5, 128 }
 0x281   :  { %p485_p1 = scmp.ne.s32.totalorder %s606_s5, %s484_s10  ;;  %p488_p2 = scmp.lt.u32.totalorder %s484_s10, %s606_s5 }
 0x283   :  { %p490_p3 = pnand %p488_p2, %p485_p1 }
 0x285   :  { %493 = shalt.err (!%p490_p3)
}
 0x286   :  { %267 = dma.vmem_to_hbm [thread:$0]  %s265_s7, 128, %s606_s5, [#allocation4]  }
 0x287   :  { %498 = dma.done.wait [#allocation4], 128  }
 0x288   :  { %499 = vsyncadd [#allocation4], 4294967168 }
 0x289   :  { %271 = vsyncpa [#allocation3], 1 }
 0x28a   :  { %272 = vsyncpa [#allocation6], 1 }
 0x28b   :  { %273 = vsyncpa [#allocation4], 1 }

</bundles_post_ra>
